<compile_context>
chip_gen: v7x
topology: tpu7x:2x2x1
jax: 0.10.0
libtpu: 0.0.40
codegen_flags: <defaults>
</compile_context>

<pallas_src>
import jax
import jax.numpy as jnp
from jax.experimental import pallas as pl
from jax.experimental.pallas import tpu as pltpu

D_IN, D_H1, D_H2, D_OUT = 784, 256, 64, 10
D_OUT_PAD = 128  # lane-dense padded output width (multiple of 128)


def _round_up(n, m):
    return ((n + m - 1) // m) * m


def mlp_kernel(x_ref, w1_ref, b1_ref, w2_ref, b2_ref, w3_ref, b3_ref, o_ref):
    # Linear(784, 256) + ReLU  (bf16 x bf16 -> f32 accumulate; elementwise in f32)
    h1 = jnp.dot(x_ref[...], w1_ref[...], preferred_element_type=jnp.float32)
    h1 = jnp.maximum(h1 + b1_ref[...], 0.0)
    # Linear(256, 64) + ReLU
    h2 = jnp.dot(h1.astype(jnp.bfloat16), w2_ref[...],
                 preferred_element_type=jnp.float32)
    h2 = jnp.maximum(h2 + b2_ref[...], 0.0)
    # Linear(64, 10)  -- weights padded to 128 output lanes (cols >= 10 are zero)
    out = jnp.dot(h2.astype(jnp.bfloat16), w3_ref[...],
                  preferred_element_type=jnp.float32)
    o_ref[...] = (out + b3_ref[...]).astype(o_ref.dtype)


def drnet_forward(x, params, *, tile_b=256):
    """Forward pass. params are f32 (in, out) weights and (1, out) biases."""
    w1, b1, w2, b2, w3, b3 = params
    B = x.shape[0]

    # Clamp the tile for tiny batches, otherwise keep the MXU-friendly 256-row
    # tile; pad ragged batches with zero rows (discarded after the call).
    tile_b = max(8, min(tile_b, _round_up(B, 8)))
    B_pad = _round_up(B, tile_b)
    if B_pad != B:
        x = jnp.pad(x, ((0, B_pad - B), (0, 0)))

    # bf16 for streamed activations + weights; f32 accumulation inside the kernel.
    xb = x.astype(jnp.bfloat16)
    w1b = w1.astype(jnp.bfloat16)
    w2b = w2.astype(jnp.bfloat16)
    # Lane-dense output: zero-pad the last layer from 10 -> 128 output columns.
    w3p = jnp.zeros((D_H2, D_OUT_PAD), jnp.bfloat16).at[:, :D_OUT].set(
        w3.astype(jnp.bfloat16))
    b3p = jnp.zeros((1, D_OUT_PAD), jnp.float32).at[:, :D_OUT].set(b3)

    grid = (B_pad // tile_b,)
    resident = lambda i: (0, 0)  # weights/biases: same whole block every step

    flops = 2 * B_pad * (D_IN * D_H1 + D_H1 * D_H2 + D_H2 * D_OUT_PAD)
    bytes_accessed = (
        B_pad * D_IN * 2                       # x stream (bf16)
        + B_pad * D_OUT_PAD * 4                # padded output (f32)
        + (D_IN * D_H1 + D_H1 * D_H2 + D_H2 * D_OUT_PAD) * 2   # weights (bf16)
        + (D_H1 + D_H2 + D_OUT_PAD) * 4        # biases (f32)
    )

    out = pl.pallas_call(
        mlp_kernel,
        out_shape=jax.ShapeDtypeStruct((B_pad, D_OUT_PAD), jnp.float32),
        grid_spec=pltpu.PrefetchScalarGridSpec(
            num_scalar_prefetch=0,
            grid=grid,
            in_specs=[
                pl.BlockSpec((tile_b, D_IN), lambda i: (i, 0)),   # x tile
                pl.BlockSpec((D_IN, D_H1), resident),             # w1
                pl.BlockSpec((1, D_H1), resident),                # b1
                pl.BlockSpec((D_H1, D_H2), resident),             # w2
                pl.BlockSpec((1, D_H2), resident),                # b2
                pl.BlockSpec((D_H2, D_OUT_PAD), resident),        # w3 (padded)
                pl.BlockSpec((1, D_OUT_PAD), resident),           # b3 (padded)
            ],
            out_specs=pl.BlockSpec((tile_b, D_OUT_PAD), lambda i: (i, 0)),
        ),
        compiler_params=pltpu.CompilerParams(
            dimension_semantics=("parallel",),
        ),
        cost_estimate=pl.CostEstimate(
            flops=flops, transcendentals=0, bytes_accessed=bytes_accessed),
    )(xb, w1b, b1, w2b, b2, w3p, b3p)

    # Drop batch padding and the zero-padded output lanes.
    return out[:B, :D_OUT]


def init_params(key):
    """Deterministic init mimicking torch.nn.Linear default (uniform +/- 1/sqrt(fan_in)).
    Weights stored as (in, out) = transpose of PyTorch's (out, in)."""
    ks = jax.random.split(key, 6)

    def linear(kw, kb, fan_in, fan_out):
        bound = 1.0 / jnp.sqrt(jnp.float32(fan_in))
        w = jax.random.uniform(kw, (fan_in, fan_out), jnp.float32, -bound, bound)
        b = jax.random.uniform(kb, (1, fan_out), jnp.float32, -bound, bound)
        return w, b

    w1, b1 = linear(ks[0], ks[1], D_IN, D_H1)
    w2, b2 = linear(ks[2], ks[3], D_H1, D_H2)
    w3, b3 = linear(ks[4], ks[5], D_H2, D_OUT)
    return (w1, b1, w2, b2, w3, b3)


def drnet_ref_bf16(x, params):
    """Reference with the same bf16-input / f32-accumulate mixed precision."""
    w1, b1, w2, b2, w3, b3 = params
    h1 = jnp.dot(x.astype(jnp.bfloat16), w1.astype(jnp.bfloat16),
                 preferred_element_type=jnp.float32)
    h1 = jnp.maximum(h1 + b1, 0.0)
    h2 = jnp.dot(h1.astype(jnp.bfloat16), w2.astype(jnp.bfloat16),
                 preferred_element_type=jnp.float32)
    h2 = jnp.maximum(h2 + b2, 0.0)
    return jnp.dot(h2.astype(jnp.bfloat16), w3.astype(jnp.bfloat16),
                   preferred_element_type=jnp.float32) + b3


def drnet_ref_f32(x, params):
    w1, b1, w2, b2, w3, b3 = params
    h1 = jnp.maximum(x @ w1 + b1, 0.0)
    h2 = jnp.maximum(h1 @ w2 + b2, 0.0)
    return h2 @ w3 + b3


if __name__ == "__main__":
    key = jax.random.PRNGKey(0)
    k_x, k_p = jax.random.split(key)

    batch = 8  # small test batch; features fixed at 784 by the module
    x = jax.random.normal(k_x, (batch, D_IN), jnp.float32)
    params = init_params(k_p)

    out = drnet_forward(x, params)
    out = jax.block_until_ready(out)
    assert out.shape == (batch, D_OUT)

    # Same-precision reference (bf16 inputs, f32 accumulation).
    ref_bf16 = drnet_ref_bf16(x, params)
    assert jnp.allclose(out, ref_bf16, atol=1e-2, rtol=1e-2)

    # Loose check against the pure-f32 PyTorch-equivalent math.
    ref_f32 = drnet_ref_f32(x, params)
    assert jnp.allclose(out, ref_f32, atol=5e-2, rtol=5e-2)

    print("KERNEL_OK")
</pallas_src>

<mosaic_0001>
module attributes {stable_mosaic.version = 11 : i64} {
  func.func @mlp_kernel(%arg0: i32, %arg1: memref<8x784xbf16, #tpu.memory_space<vmem>>, %arg2: memref<784x256xbf16, #tpu.memory_space<vmem>>, %arg3: memref<1x256xf32, #tpu.memory_space<vmem>>, %arg4: memref<256x64xbf16, #tpu.memory_space<vmem>>, %arg5: memref<1x64xf32, #tpu.memory_space<vmem>>, %arg6: memref<64x128xbf16, #tpu.memory_space<vmem>>, %arg7: memref<1x128xf32, #tpu.memory_space<vmem>>, %arg8: memref<8x128xf32, #tpu.memory_space<vmem>>) attributes {dimension_semantics = [#tpu.dimension_semantics<parallel>], iteration_bounds = array<i64: 1>, scalar_prefetch = 0 : i64, scratch_operands = 0 : i64, tpu.core_type = #tpu.core_type<tc>, window_params = [{transform_indices = @transform_0, window_bounds = array<i64: 8, 784>}, {pipeline_mode = #tpu.pipeline_mode<synchronous>, transform_indices = @transform_1, window_bounds = array<i64: 784, 256>}, {pipeline_mode = #tpu.pipeline_mode<synchronous>, transform_indices = @transform_2, window_bounds = array<i64: 1, 256>}, {pipeline_mode = #tpu.pipeline_mode<synchronous>, transform_indices = @transform_3, window_bounds = array<i64: 256, 64>}, {pipeline_mode = #tpu.pipeline_mode<synchronous>, transform_indices = @transform_4, window_bounds = array<i64: 1, 64>}, {pipeline_mode = #tpu.pipeline_mode<synchronous>, transform_indices = @transform_5, window_bounds = array<i64: 64, 128>}, {pipeline_mode = #tpu.pipeline_mode<synchronous>, transform_indices = @transform_6, window_bounds = array<i64: 1, 128>}, {transform_indices = @transform_7, window_bounds = array<i64: 8, 128>}]} {
    %c0 = arith.constant 0 : index
    %c0_0 = arith.constant 0 : index
    %0 = vector.load %arg1[%c0, %c0_0] : memref<8x784xbf16, #tpu.memory_space<vmem>>, vector<8x784xbf16>
    %c0_1 = arith.constant 0 : index
    %c0_2 = arith.constant 0 : index
    %1 = vector.load %arg2[%c0_1, %c0_2] : memref<784x256xbf16, #tpu.memory_space<vmem>>, vector<784x256xbf16>
    %cst = arith.constant dense<0.000000e+00> : vector<8x256xf32>
    %2 = tpu.matmul %0, %1, %cst {dimension_numbers = #tpu.dot_dimension_numbers<[1], [0], [0], [1], [0, 0, 1, 1], [], []>} : vector<8x784xbf16>, vector<784x256xbf16>, vector<8x256xf32> -> vector<8x256xf32>
    %c0_3 = arith.constant 0 : index
    %c0_4 = arith.constant 0 : index
    %3 = vector.load %arg3[%c0_3, %c0_4] : memref<1x256xf32, #tpu.memory_space<vmem>>, vector<1x256xf32>
    %4 = vector.broadcast %3 : vector<1x256xf32> to vector<8x256xf32>
    %5 = arith.addf %2, %4 : vector<8x256xf32>
    %cst_5 = arith.constant 0.000000e+00 : f32
    %6 = vector.broadcast %cst_5 : f32 to vector<8x256xf32>
    %7 = arith.maximumf %5, %6 : vector<8x256xf32>
    %8 = arith.truncf %7 : vector<8x256xf32> to vector<8x256xbf16>
    %c0_6 = arith.constant 0 : index
    %c0_7 = arith.constant 0 : index
    %9 = vector.load %arg4[%c0_6, %c0_7] : memref<256x64xbf16, #tpu.memory_space<vmem>>, vector<256x64xbf16>
    %cst_8 = arith.constant dense<0.000000e+00> : vector<8x64xf32>
    %10 = tpu.matmul %8, %9, %cst_8 {dimension_numbers = #tpu.dot_dimension_numbers<[1], [0], [0], [1], [0, 0, 1, 1], [], []>} : vector<8x256xbf16>, vector<256x64xbf16>, vector<8x64xf32> -> vector<8x64xf32>
    %c0_9 = arith.constant 0 : index
    %c0_10 = arith.constant 0 : index
    %11 = vector.load %arg5[%c0_9, %c0_10] : memref<1x64xf32, #tpu.memory_space<vmem>>, vector<1x64xf32>
    %12 = vector.broadcast %11 : vector<1x64xf32> to vector<8x64xf32>
    %13 = arith.addf %10, %12 : vector<8x64xf32>
    %cst_11 = arith.constant 0.000000e+00 : f32
    %14 = vector.broadcast %cst_11 : f32 to vector<8x64xf32>
    %15 = arith.maximumf %13, %14 : vector<8x64xf32>
    %16 = arith.truncf %15 : vector<8x64xf32> to vector<8x64xbf16>
    %c0_12 = arith.constant 0 : index
    %c0_13 = arith.constant 0 : index
    %17 = vector.load %arg6[%c0_12, %c0_13] : memref<64x128xbf16, #tpu.memory_space<vmem>>, vector<64x128xbf16>
    %cst_14 = arith.constant dense<0.000000e+00> : vector<8x128xf32>
    %18 = tpu.matmul %16, %17, %cst_14 {dimension_numbers = #tpu.dot_dimension_numbers<[1], [0], [0], [1], [0, 0, 1, 1], [], []>} : vector<8x64xbf16>, vector<64x128xbf16>, vector<8x128xf32> -> vector<8x128xf32>
    %c0_15 = arith.constant 0 : index
    %c0_16 = arith.constant 0 : index
    %19 = vector.load %arg7[%c0_15, %c0_16] : memref<1x128xf32, #tpu.memory_space<vmem>>, vector<1x128xf32>
    %20 = vector.broadcast %19 : vector<1x128xf32> to vector<8x128xf32>
    %21 = arith.addf %18, %20 : vector<8x128xf32>
    %c0_17 = arith.constant 0 : index
    %c0_18 = arith.constant 0 : index
    %22 = vector.load %arg8[%c0_17, %c0_18] : memref<8x128xf32, #tpu.memory_space<vmem>>, vector<8x128xf32>
    tpu.vector_store %arg8[%c0_17, %c0_18], %21 {strides = array<i32>} : memref<8x128xf32, #tpu.memory_space<vmem>>, vector<8x128xf32>,
    return
  }
  func.func @transform_0(%arg0: i32) -> (i32, i32) {
    %c0_i32 = arith.constant 0 : i32
    %c0_i32_0 = arith.constant 0 : i32
    return %arg0, %c0_i32 : i32, i32
  }
  func.func @transform_1(%arg0: i32) -> (i32, i32) {
    %c0_i32 = arith.constant 0 : i32
    %c0_i32_0 = arith.constant 0 : i32
    %c0_i32_1 = arith.constant 0 : i32
    return %c0_i32, %c0_i32_0 : i32, i32
  }
  func.func @transform_2(%arg0: i32) -> (i32, i32) {
    %c0_i32 = arith.constant 0 : i32
    %c0_i32_0 = arith.constant 0 : i32
    %c0_i32_1 = arith.constant 0 : i32
    return %c0_i32, %c0_i32_0 : i32, i32
  }
  func.func @transform_3(%arg0: i32) -> (i32, i32) {
    %c0_i32 = arith.constant 0 : i32
    %c0_i32_0 = arith.constant 0 : i32
    %c0_i32_1 = arith.constant 0 : i32
    return %c0_i32, %c0_i32_0 : i32, i32
  }
  func.func @transform_4(%arg0: i32) -> (i32, i32) {
    %c0_i32 = arith.constant 0 : i32
    %c0_i32_0 = arith.constant 0 : i32
    %c0_i32_1 = arith.constant 0 : i32
    return %c0_i32, %c0_i32_0 : i32, i32
  }
  func.func @transform_5(%arg0: i32) -> (i32, i32) {
    %c0_i32 = arith.constant 0 : i32
    %c0_i32_0 = arith.constant 0 : i32
    %c0_i32_1 = arith.constant 0 : i32
    return %c0_i32, %c0_i32_0 : i32, i32
  }
  func.func @transform_6(%arg0: i32) -> (i32, i32) {
    %c0_i32 = arith.constant 0 : i32
    %c0_i32_0 = arith.constant 0 : i32
    %c0_i32_1 = arith.constant 0 : i32
    return %c0_i32, %c0_i32_0 : i32, i32
  }
  func.func @transform_7(%arg0: i32) -> (i32, i32) {
    %c0_i32 = arith.constant 0 : i32
    %c0_i32_0 = arith.constant 0 : i32
    return %arg0, %c0_i32 : i32, i32
  }
}

</mosaic_0001>

<bundles_post_ra>
// kernel: tpu_custom_call.1
= control target key start
LH: loop header
LB: loop body
LE: loop exit
PB: predicated region body
PF: predicated region fallthrough
CT: control target
= control target key end

     0   :  { %12 = vsyncpa [#allocation3], 0  ;;  %s1689_s0 = inlined_call_operand.vmem [shape: bf16[8,784], index: 0, kind: input, shape index: {}]   ;;  %s1690_s1 = inlined_call_operand.hbm [shape: bf16[784,256], index: 1, kind: input, shape index: {}]   ;;  %s1691_s2 = inlined_call_operand.vmem [shape: f32[1,256], index: 2, kind: input, shape index: {}]   ;;  %s1692_s3 = inlined_call_operand.vmem [shape: bf16[256,64], index: 3, kind: input, shape index: {}]   ;;  %s1693_s4 = inlined_call_operand.vmem [shape: f32[1,64], index: 4, kind: input, shape index: {}]   ;;  %s1694_s5 = inlined_call_operand.vmem [shape: bf16[64,128], index: 5, kind: input, shape index: {}]   ;;  %s1695_s6 = inlined_call_operand.vmem [shape: f32[1,128], index: 6, kind: input, shape index: {}]   ;;  %s1696_s7 = inlined_call_operand.hbm [shape: f32[8,128], index: 7, kind: output, shape index: {}]  }
   0x1   :  { %13 = vsyncpa [#allocation4], 0  ;;  %s1525_s24 = smov [#allocation2]   ;;  %s1477_s28 = scalar_lea.hbm %s1690_s1, 12544 }
   0x2   :  { %s21_s25 = sshll.u32 %s1525_s24, 4  ;;  %p1478_p0 = scmp.ne.s32.totalorder %s1690_s1, %s1477_s28  ;;  %s22_s25 = int_to_ptr.vmem [resolvable:$true] %s21_s25 }
   0x3   :  { %p1481_p1 = scmp.lt.u32.totalorder %s1477_s28, %s1690_s1 }
   0x5   :  { %p1483_p2 = pnand %p1481_p1, %p1478_p0 }
   0x7   :  { %1486 = shalt.err (!%p1483_p2)
}
   0x8   :  { %s1487_s10 = scalar_lea.vmem %s22_s25, 12544  ;;  %p1492_p4 = scmp.lt.s32.totalorder %s22_s25, %s22_s25 }
   0x9   :  { %p1488_p3 = scmp.ne.s32.totalorder %s22_s25, %s1487_s10  ;;  %p1493_p5 = scmp.lt.s32.totalorder %s1487_s10, %s1487_s10 }
   0xb   :  { %p1494_p6 = por %p1493_p5, %p1492_p4 }
   0xd   :  { %p1495_p7 = pnand %p1494_p6, %p1488_p3 }
   0xf   :  { %1498 = shalt.err (!%p1495_p7)
}
  0x10   :  { %s1526_s11 = smov 128   ;;  %s1527_s12 = smov 8  }
  0x11   :  { %27 = dma.hbm_to_vmem [thread:$0]  %s1690_s1, 12544, %s22_s25, [#allocation3], %s1526_s11, %s1526_s11, %s1527_s12  }
  0x12   :  { %1521 = dma.done.wait [#allocation3], 12544  }
  0x13   :  { %1522 = vsyncadd [#allocation3], 4294954752  ;;  %v1303_v0 = vld [vmem:[#allocation2 + $0x104] ss:$8 sps:$4 sm:$0xff]   ;;  %v1305_v1 = vld [vmem:[#allocation2 + $0x100] ss:$8 sps:$4 sm:$0xff]  }
  0x14   :  { %715 = vmatprep.subr.bf16.mxu0 %v1303_v0  ;;  %v1306_v2 = vld [vmem:[#allocation2 + $0x114] ss:$8 sps:$4 sm:$0xff]   ;;  %v1308_v3 = vld [vmem:[#allocation2 + $0x110] ss:$8 sps:$4 sm:$0xff]   ;;  %v1309_v4 = vld [vmem:[#allocation2 + $0x124] ss:$8 sps:$4 sm:$0xff]  }
  0x15   :  { %716 = vmatpush1.bf16.msra.mxu0 %v1305_v1  ;;  %v1311_v5 = vld [vmem:[#allocation2 + $0x120] ss:$8 sps:$4 sm:$0xff]   ;;  %v1312_v6 = vld [vmem:[#allocation2 + $0x134] ss:$8 sps:$4 sm:$0xff]   ;;  %v1314_v7 = vld [vmem:[#allocation2 + $0x130] ss:$8 sps:$4 sm:$0xff]  }
  0x16   :  { %717 = vmatprep.subr.bf16.mxu0 %v1306_v2  ;;  %v1315_v8 = vld [vmem:[#allocation2 + $0x144] ss:$8 sps:$4 sm:$0xff]   ;;  %v1317_v9 = vld [vmem:[#allocation2 + $0x140] ss:$8 sps:$4 sm:$0xff]   ;;  %v1318_v10 = vld [vmem:[#allocation2 + $0x154] ss:$8 sps:$4 sm:$0xff]  }
  0x17   :  { %v1320_v11 = vld [vmem:[#allocation2 + $0x150] ss:$8 sps:$4 sm:$0xff]   ;;  %v1345_v12 = vld [vmem:[#allocation2 + $0x4] ss:$8 sps:$4 sm:$0xff]   ;;  %v1347_v13 = vld [vmem:[#allocation2] ss:$8 sps:$4 sm:$0xff]  }
  0x18   :  { %v1321_v14 = vld [vmem:[#allocation2 + $0x164] ss:$8 sps:$4 sm:$0xff]   ;;  %674 = vmatprep.subr.bf16.mxu1 %v1345_v12  ;;  %v1351_v15 = vld [vmem:[#allocation2 + $0x14] ss:$8 sps:$4 sm:$0xff]   ;;  %v1353_v16 = vld [vmem:[#allocation2 + $0x10] ss:$8 sps:$4 sm:$0xff]  }
  0x19   :  { %718 = vmatpush1.bf16.msra.mxu0 %v1308_v3  ;;  %675 = vmatpush1.bf16.msra.mxu1 %v1347_v13  ;;  %v1323_v17 = vld [vmem:[#allocation2 + $0x160] ss:$8 sps:$4 sm:$0xff]   ;;  %v1324_v18 = vld [vmem:[#allocation2 + $0x174] ss:$8 sps:$4 sm:$0xff]   ;;  %v1357_v19 = vld [vmem:[#allocation2 + $0x24] ss:$8 sps:$4 sm:$0xff]  }
  0x1a   :  { %719 = vmatprep.subr.bf16.mxu0 %v1309_v4  ;;  %676 = vmatprep.subr.bf16.mxu1 %v1351_v15  ;;  %v1587_v20 = vld [vmem:[%s1689_s0 + $0x8] sm:$0xff]  ;;  %v1326_v21 = vld [vmem:[#allocation2 + $0x170] ss:$8 sps:$4 sm:$0xff]   ;;  %v1365_v24 = vld [vmem:[#allocation2 + $0x34] ss:$8 sps:$4 sm:$0xff]   ;;  %vm670_vm0 = vcmask 130048  }
  0x1b   :  { %v1359_v22 = vld [vmem:[#allocation2 + $0x20] ss:$8 sps:$4 sm:$0xff]   ;;  %v1121_v23 = vcombine.high %v1587_v20, %v1587_v20  ;;  %v1327_v25 = vld [vmem:[#allocation2 + $0x184] ss:$8 sps:$4 sm:$0xff]   ;;  %v1367_v27 = vld [vmem:[#allocation2 + $0x30] ss:$8 sps:$4 sm:$0xff]   ;;  %v1120_v60 = vcombine.low %v1587_v20, %v1587_v20 }
  0x1c   :  { %v1329_v26 = vld [vmem:[#allocation2 + $0x180] ss:$8 sps:$4 sm:$0xff]   ;;  %v1371_v28 = vld [vmem:[#allocation2 + $0x44] ss:$8 sps:$4 sm:$0xff]   ;;  %v1330_v29 = vld [vmem:[#allocation2 + $0x194] ss:$8 sps:$4 sm:$0xff]  }
  0x1d   :  { %720 = vmatpush1.bf16.msra.mxu0 %v1311_v5  ;;  %677 = vmatpush1.bf16.msra.mxu1 %v1353_v16  ;;  %v1332_v30 = vld [vmem:[#allocation2 + $0x190] ss:$8 sps:$4 sm:$0xff]   ;;  %v1373_v31 = vld [vmem:[#allocation2 + $0x40] ss:$8 sps:$4 sm:$0xff]   ;;  %v1377_v32 = vld [vmem:[#allocation2 + $0x54] ss:$8 sps:$4 sm:$0xff]  }
  0x1e   :  { %721 = vmatprep.subr.bf16.mxu0 %v1312_v6  ;;  %678 = vmatprep.subr.bf16.mxu1 %v1357_v19  ;;  %v1333_v33 = vld [vmem:[#allocation2 + $0x1a4] ss:$8 sps:$4 sm:$0xff]   ;;  %v1335_v34 = vld [vmem:[#allocation2 + $0x1a0] ss:$8 sps:$4 sm:$0xff]   ;;  %v1379_v35 = vld [vmem:[#allocation2 + $0x50] ss:$8 sps:$4 sm:$0xff]  }
  0x1f   :  { %747 = vmatprep.mubr.bf16.mxu0 %v1121_v23  ;;  %v1383_v36 = vld [vmem:[#allocation2 + $0x64] ss:$8 sps:$4 sm:$0xff]   ;;  %v1336_v37 = vld [vmem:[#allocation2 + $0x1b4] ss:$8 sps:$4 sm:$0xff]   ;;  %v1338_v38 = vld [vmem:[#allocation2 + $0x1b0] ss:$8 sps:$4 sm:$0xff]  }
  0x20   :  { %v1385_v39 = vld [vmem:[#allocation2 + $0x60] ss:$8 sps:$4 sm:$0xff]   ;;  %v1389_v40 = vld [vmem:[#allocation2 + $0x74] ss:$8 sps:$4 sm:$0xff]   ;;  %v1339_v41 = vld [vmem:[#allocation2 + $0x1c4] ss:$8 sps:$4 sm:$0xff]  }
  0x21   :  { %722 = vmatpush1.bf16.msra.mxu0 %v1314_v7  ;;  %679 = vmatpush1.bf16.msra.mxu1 %v1359_v22  ;;  %v1341_v42 = vld [vmem:[#allocation2 + $0x1c0] ss:$8 sps:$4 sm:$0xff]   ;;  %v1391_v43 = vld [vmem:[#allocation2 + $0x70] ss:$8 sps:$4 sm:$0xff]   ;;  %v1395_v44 = vld [vmem:[#allocation2 + $0x84] ss:$8 sps:$4 sm:$0xff]  }
  0x22   :  { %723 = vmatprep.subr.bf16.mxu0 %v1315_v8  ;;  %680 = vmatprep.subr.bf16.mxu1 %v1365_v24  ;;  %v1342_v45 = vld [vmem:[#allocation2 + $0x1d4] ss:$8 sps:$4 sm:$0xff]   ;;  %v1344_v46 = vld [vmem:[#allocation2 + $0x1d0] ss:$8 sps:$4 sm:$0xff]   ;;  %v1397_v47 = vld [vmem:[#allocation2 + $0x80] ss:$8 sps:$4 sm:$0xff]  }
  0x23   :  { %v1401_v48 = vld [vmem:[#allocation2 + $0x94] ss:$8 sps:$4 sm:$0xff]   ;;  %v1348_v49 = vld [vmem:[#allocation2 + $0x1e4] ss:$8 sps:$4 sm:$0xff]   ;;  %v1350_v50 = vld [vmem:[#allocation2 + $0x1e0] ss:$8 sps:$4 sm:$0xff]  }
  0x24   :  { %v1403_v51 = vld [vmem:[#allocation2 + $0x90] ss:$8 sps:$4 sm:$0xff]   ;;  %v1407_v52 = vld [vmem:[#allocation2 + $0xa4] ss:$8 sps:$4 sm:$0xff]   ;;  %v1354_v53 = vld [vmem:[#allocation2 + $0x1f4] ss:$8 sps:$4 sm:$0xff]  }
  0x25   :  { %724 = vmatpush1.bf16.msra.mxu0 %v1317_v9  ;;  %681 = vmatpush1.bf16.msra.mxu1 %v1367_v27  ;;  %v1356_v54 = vld [vmem:[#allocation2 + $0x1f0] ss:$8 sps:$4 sm:$0xff]   ;;  %v1409_v55 = vld [vmem:[#allocation2 + $0xa0] ss:$8 sps:$4 sm:$0xff]   ;;  %v1413_v56 = vld [vmem:[#allocation2 + $0xb4] ss:$8 sps:$4 sm:$0xff]  }
  0x26   :  { %725 = vmatprep.subr.bf16.mxu0 %v1318_v10  ;;  %682 = vmatprep.subr.bf16.mxu1 %v1371_v28  ;;  %v1364_v57 = vld [vmem:[#allocation2 + $0x204] ss:$8 sps:$4 sm:$0xff]   ;;  %v1362_v58 = vld [vmem:[#allocation2 + $0x200] ss:$8 sps:$4 sm:$0xff]   ;;  %v1415_v61 = vld [vmem:[#allocation2 + $0xb0] ss:$8 sps:$4 sm:$0xff]  }
  0x27   :  { %v42_v59 = vld [vmem:[%s1689_s0] sm:$0xff]  ;;  %v1370_v0 = vld [vmem:[#allocation2 + $0x214] ss:$8 sps:$4 sm:$0xff]   ;;  %v1368_v1 = vld [vmem:[#allocation2 + $0x210] ss:$8 sps:$4 sm:$0xff]   ;;  %v1528_v24 = vmov 0  }
  0x28   :  { %v1119_v62 = vcombine.high %v42_v59, %v42_v59  ;;  %v1419_v63 = vld [vmem:[#allocation2 + $0xc4] ss:$8 sps:$4 sm:$0xff]   ;;  %v1421_v2 = vld [vmem:[#allocation2 + $0xc0] ss:$8 sps:$4 sm:$0xff]   ;;  %v1599_v3 = vld [vmem:[%s1689_s0 + $0x10] sm:$0xff]  ;;  %v1118_v19 = vcombine.low %v42_v59, %v42_v59  ;;  %vm1530_vm1 = vmmov 0  }
  0x29   :  { %726 = vmatpush1.bf16.msra.mxu0 %v1320_v11  ;;  %683 = vmatpush1.bf16.msra.mxu1 %v1373_v31  ;;  %v1425_v4 = vld [vmem:[#allocation2 + $0xd4] ss:$8 sps:$4 sm:$0xff]   ;;  %v1123_v5 = vcombine.high %v1599_v3, %v1599_v3  ;;  %v1376_v6 = vld [vmem:[#allocation2 + $0x224] ss:$8 sps:$4 sm:$0xff]   ;;  %v1374_v7 = vld [vmem:[#allocation2 + $0x220] ss:$8 sps:$4 sm:$0xff]  }
  0x2a   :  { %727 = vmatprep.subr.bf16.mxu0 %v1321_v14  ;;  %684 = vmatprep.subr.bf16.mxu1 %v1377_v32  ;;  %v1382_v8 = vld [vmem:[#allocation2 + $0x234] ss:$8 sps:$4 sm:$0xff]   ;;  %v1427_v9 = vld [vmem:[#allocation2 + $0xd0] ss:$8 sps:$4 sm:$0xff]   ;;  %v1431_v10 = vld [vmem:[#allocation2 + $0xe4] ss:$8 sps:$4 sm:$0xff]  }
  0x2b   :  { %706 = vmatprep.mubr.bf16.mxu1 %v1119_v62  ;;  %v1433_v11 = vld [vmem:[#allocation2 + $0xe0] ss:$8 sps:$4 sm:$0xff]   ;;  %v1380_v12 = vld [vmem:[#allocation2 + $0x230] ss:$8 sps:$4 sm:$0xff]   ;;  %v1437_v13 = vld [vmem:[#allocation2 + $0xf4] ss:$8 sps:$4 sm:$0xff]  }
  0x2c   :  { %v1388_v14 = vld [vmem:[#allocation2 + $0x244] ss:$8 sps:$4 sm:$0xff]   ;;  %v1439_v15 = vld [vmem:[#allocation2 + $0xf0] ss:$8 sps:$4 sm:$0xff]   ;;  %v1386_v16 = vld [vmem:[#allocation2 + $0x240] ss:$8 sps:$4 sm:$0xff]  }
  0x2d   :  { %728 = vmatpush1.bf16.msra.mxu0 %v1323_v17  ;;  %685 = vmatpush1.bf16.msra.mxu1 %v1379_v35  ;;  %v1450_v17 = vld [vmem:[#allocation2 + $0x304] ss:$8 sps:$4 sm:$0xff]   ;;  %v1448_v20 = vld [vmem:[#allocation2 + $0x300] ss:$8 sps:$4 sm:$0xff]   ;;  %v1456_v27 = vld [vmem:[%s1689_s0 + $0x18] ss:$0 sps:$4 sm:$0xff]  }
  0x2e   :  { %729 = vmatprep.subr.bf16.mxu0 %v1324_v18  ;;  %686 = vmatprep.subr.bf16.mxu1 %v1383_v36  ;;  %v1394_v18 = vld [vmem:[#allocation2 + $0x254] ss:$8 sps:$4 sm:$0xff]   ;;  %v1457_v22 = vld [vmem:[%s1692_s3 + $0x40] sm:$0xff]   ;;  %v1460_v32 = vld [vmem:[%s1692_s3 + $0x8] sm:$0xff]   ;;  %vm1058_vm2 = vcmask 523264  }
  0x2f   :  { %v1400_v23 = vld [vmem:[#allocation2 + $0x264] ss:$8 sps:$4 sm:$0xff]   ;;  %v1418_v35 = vld [vmem:[#allocation2 + $0x294] ss:$8 sps:$4 sm:$0xff]  }
  0x30   :  { %v1458_v28 = vld [vmem:[%s1692_s3] sm:$0xff]   ;;  %v1462_v36 = vld [vmem:[%s1692_s3 + $0x10] sm:$0xff]   ;;  %v1471_v59 = vld [vmem:[%s1692_s3 + $0x78] sm:$0xff]  }
  0x31   :  { %730 = vmatpush1.bf16.msra.mxu0 %v1326_v21  ;;  %687 = vmatpush1.bf16.msra.mxu1 %v1385_v39  ;;  %v1392_v21 = vld [vmem:[#allocation2 + $0x250] ss:$8 sps:$4 sm:$0xff]   ;;  %v1412_v31 = vld [vmem:[#allocation2 + $0x284] ss:$8 sps:$4 sm:$0xff]   ;;  %v1422_v39 = vld [vmem:[#allocation2 + $0x2a0] ss:$8 sps:$4 sm:$0xff]  }
  0x32   :  { %731 = vmatprep.subr.bf16.mxu0 %v1327_v25  ;;  %688 = vmatprep.subr.bf16.mxu1 %v1389_v40  ;;  %v1398_v25 = vld [vmem:[#allocation2 + $0x260] ss:$8 sps:$4 sm:$0xff]   ;;  %v1430_v40 = vld [vmem:[#allocation2 + $0x2b4] ss:$8 sps:$4 sm:$0xff]  }
  0x35   :  { %732 = vmatpush1.bf16.msra.mxu0 %v1329_v26  ;;  %689 = vmatpush1.bf16.msra.mxu1 %v1391_v43  ;;  %v1406_v26 = vld [vmem:[#allocation2 + $0x274] ss:$8 sps:$4 sm:$0xff]   ;;  %v1434_v43 = vld [vmem:[#allocation2 + $0x2c0] ss:$8 sps:$4 sm:$0xff]  }
  0x36   :  { %733 = vmatprep.subr.bf16.mxu0 %v1330_v29  ;;  %690 = vmatprep.subr.bf16.mxu1 %v1395_v44  ;;  %v1404_v29 = vld [vmem:[#allocation2 + $0x270] ss:$8 sps:$4 sm:$0xff]   ;;  %v1442_v44 = vld [vmem:[#allocation2 + $0x2d4] ss:$8 sps:$4 sm:$0xff]  }
  0x39   :  { %734 = vmatpush1.bf16.msra.mxu0 %v1332_v30  ;;  %691 = vmatpush1.bf16.msra.mxu1 %v1397_v47  ;;  %v1459_v30 = vld [vmem:[%s1692_s3 + $0x48] sm:$0xff]  }
  0x3a   :  { %735 = vmatprep.subr.bf16.mxu0 %v1333_v33  ;;  %692 = vmatprep.subr.bf16.mxu1 %v1401_v48  ;;  %v1410_v33 = vld [vmem:[#allocation2 + $0x280] ss:$8 sps:$4 sm:$0xff]   ;;  %v1453_v48 = vld [vmem:[#allocation2 + $0x2f4] ss:$8 sps:$4 sm:$0xff]  }
  0x3b   :  { %v1445_v47 = vld [vmem:[#allocation2 + $0x2e0] ss:$8 sps:$4 sm:$0xff]  }
  0x3d   :  { %736 = vmatpush1.bf16.msra.mxu0 %v1335_v34  ;;  %693 = vmatpush1.bf16.msra.mxu1 %v1403_v51  ;;  %v1461_v34 = vld [vmem:[%s1692_s3 + $0x50] sm:$0xff]   ;;  %v1463_v51 = vld [vmem:[%s1692_s3 + $0x58] sm:$0xff]  }
  0x3e   :  { %737 = vmatprep.subr.bf16.mxu0 %v1336_v37  ;;  %694 = vmatprep.subr.bf16.mxu1 %v1407_v52  ;;  %v1416_v37 = vld [vmem:[#allocation2 + $0x290] ss:$8 sps:$4 sm:$0xff]  }
  0x3f   :  { %v1464_v52 = vld [vmem:[%s1692_s3 + $0x18] sm:$0xff]  }
  0x41   :  { %738 = vmatpush1.bf16.msra.mxu0 %v1338_v38  ;;  %695 = vmatpush1.bf16.msra.mxu1 %v1409_v55  ;;  %v1424_v38 = vld [vmem:[#allocation2 + $0x2a4] ss:$8 sps:$4 sm:$0xff]  }
  0x42   :  { %739 = vmatprep.subr.bf16.mxu0 %v1339_v41  ;;  %696 = vmatprep.subr.bf16.mxu1 %v1413_v56  ;;  %v1428_v41 = vld [vmem:[#allocation2 + $0x2b0] ss:$8 sps:$4 sm:$0xff]   ;;  %v1467_v55 = vld [vmem:[%s1692_s3 + $0x68] sm:$0xff]  }
  0x43   :  { %v1468_v56 = vld [vmem:[%s1692_s3 + $0x28] sm:$0xff]  }
  0x45   :  { %740 = vmatpush1.bf16.msra.mxu0 %v1341_v42  ;;  %697 = vmatpush1.bf16.msra.mxu1 %v1415_v61  ;;  %v1436_v42 = vld [vmem:[#allocation2 + $0x2c4] ss:$8 sps:$4 sm:$0xff]   ;;  %v1529_v61 = vmov 0.0  }
  0x46   :  { %741 = vmatprep.subr.bf16.mxu0 %v1342_v45  ;;  %698 = vmatprep.subr.bf16.mxu1 %v1419_v63  ;;  %v1440_v45 = vld [vmem:[#allocation2 + $0x2d0] ss:$8 sps:$4 sm:$0xff]  }
  0x49   :  { %742 = vmatpush1.bf16.msra.mxu0 %v1344_v46  ;;  %699 = vmatpush1.bf16.msra.mxu1 %v1421_v2  ;;  %v1447_v46 = vld [vmem:[#allocation2 + $0x2e4] ss:$8 sps:$4 sm:$0xff]  }
  0x4a   :  { %743 = vmatprep.subr.bf16.mxu0 %v1348_v49  ;;  %700 = vmatprep.subr.bf16.mxu1 %v1425_v4  ;;  %v1451_v49 = vld [vmem:[#allocation2 + $0x2f0] ss:$8 sps:$4 sm:$0xff]  }
  0x4d   :  { %744 = vmatpush1.bf16.msra.mxu0 %v1350_v50  ;;  %701 = vmatpush1.bf16.msra.mxu1 %v1427_v9  ;;  %v1122_v50 = vcombine.low %v1599_v3, %v1599_v3  ;;  %v144_v9 = vld [vmem:[%s1691_s2] sm:$0x3] }
  0x4e   :  { %745 = vmatprep.subr.bf16.mxu0 %v1354_v53  ;;  %702 = vmatprep.subr.bf16.mxu1 %v1431_v10  ;;  %v1465_v53 = vld [vmem:[%s1692_s3 + $0x60] sm:$0xff]  }
  0x51   :  { %746 = vmatpush1.bf16.msra.mxu0 %v1356_v54  ;;  %703 = vmatpush1.bf16.msra.mxu1 %v1433_v11  ;;  %v1466_v54 = vld [vmem:[%s1692_s3 + $0x20] sm:$0xff]  }
  0x52   :  { %756 = vmatprep.subr.bf16.mxu0 %v1364_v57  ;;  %704 = vmatprep.subr.bf16.mxu1 %v1437_v13  ;;  %v1469_v57 = vld [vmem:[%s1692_s3 + $0x70] sm:$0xff]  }
  0x54   :  { %748 = vmatmul.mubr.bf16.vlgmr.msra.gmra.mrb[0].mxu0 %v1120_v60  ;;  %v1472_v60 = vld [vmem:[%s1692_s3 + $0x38] sm:$0xff]  }
  0x55   :  { %757 = vmatpush1.bf16.msra.mxu0 %v1362_v58  ;;  %788 = vmatprep.mubr.bf16.mxu0 %v1123_v5  ;;  %v1470_v58 = vld [vmem:[%s1692_s3 + $0x30] sm:$0xff]  }
  0x56   :  { %758 = vmatprep.subr.bf16.mxu0 %v1370_v0  ;;  %705 = vmatpush1.bf16.msra.mxu1 %v1439_v15 }
  0x57   :  { %797 = vmatprep.subr.bf16.mxu1 %v1450_v17 }
  0x59   :  { %759 = vmatpush1.bf16.msra.mxu0 %v1368_v1  ;;  %707 = vmatmul.mubr.bf16.vlgmr.msra.gmra.mrb[0].mxu1 %v1118_v19 }
  0x5a   :  { %760 = vmatprep.subr.bf16.mxu0 %v1376_v6  ;;  %798 = vmatpush1.bf16.msra.mxu1 %v1448_v20  ;;  %v146_v6 = vlaneseq }
  0x5b   :  { %829 = vmatprep.mubr.bf16.mxu1 %v1528_v24  ;;  %1247 = vmatprep.subr.bf16.mxu1 %v1457_v22 }
  0x5d   :  { %761 = vmatpush1.bf16.msra.mxu0 %v1374_v7  ;;  %v147_v7 = vshrl.u32 %v146_v6, 7 }
  0x5e   :  { %762 = vmatprep.subr.bf16.mxu0 %v1382_v8 }
  0x5f   :  { %v148_v8 = vsub.s32 0, %v147_v7  ;;  %v152_v10 = vsub.s32 1, %v147_v7 }
  0x61   :  { %763 = vmatpush1.bf16.msra.mxu0 %v1380_v12  ;;  %1223 = vmatmul.mubr.msk.bf16.vlgmr.msra.gmra.mrb[4].mxu1 %vm670_vm0, %v1456_v27  ;;  %v149_v11 = vrot.slane %v144_v9, %v148_v8  ;;  %v153_v12 = vrot.slane %v144_v9, %v152_v10 }
  0x62   :  { %764 = vmatprep.subr.bf16.mxu0 %v1388_v14  ;;  %1248 = vmatpush3.bf16.msra.mxu1 %v1458_v28  ;;  %v1474_v28 = vld [vmem:[%s1694_s5 + $0x8] sm:$0xff]  }
  0x63   :  { %1249 = vmatprep.subr.bf16.mxu1 %v1459_v30  ;;  %v1476_v30 = vld [vmem:[%s1694_s5 + $0x18] sm:$0xff]  }
  0x65   :  { %765 = vmatpush1.bf16.msra.mxu0 %v1386_v16 }
  0x66   :  { %766 = vmatprep.subr.bf16.mxu0 %v1394_v18  ;;  %1250 = vmatpush3.bf16.msra.mxu1 %v1460_v32  ;;  %v1224_v32 = vld [vmem:[%s1693_s4] ss:$0 sm:$0xff] }
  0x67   :  { %1251 = vmatprep.subr.bf16.mxu1 %v1461_v34 }
  0x69   :  { %767 = vmatpush1.bf16.msra.mxu0 %v1392_v21 }
  0x6a   :  { %768 = vmatprep.subr.bf16.mxu0 %v1400_v23  ;;  %1252 = vmatpush3.bf16.msra.mxu1 %v1462_v36 }
  0x6b   :  { %1253 = vmatprep.subr.bf16.mxu1 %v1463_v51 }
  0x6d   :  { %769 = vmatpush1.bf16.msra.mxu0 %v1398_v25 }
  0x6e   :  { %770 = vmatprep.subr.bf16.mxu0 %v1406_v26  ;;  %1254 = vmatpush3.bf16.msra.mxu1 %v1464_v52  ;;  %v1473_v26 = vld [vmem:[%s1694_s5] sm:$0xff]  }
  0x6f   :  { %1255 = vmatprep.subr.bf16.mxu1 %v1465_v53 }
  0x71   :  { %771 = vmatpush1.bf16.msra.mxu0 %v1404_v29  ;;  %v1475_v29 = vld [vmem:[%s1694_s5 + $0x10] sm:$0xff]   ;;  %s1531_s5 = smov [#allocation5]  }
  0x72   :  { %772 = vmatprep.subr.bf16.mxu0 %v1412_v31  ;;  %1256 = vmatpush3.bf16.msra.mxu1 %v1466_v54  ;;  %s1109_s16 = sshll.u32 %s1531_s5, 4  ;;  %s1110_s16 = int_to_ptr.vmem [resolvable:$true] %s1109_s16 }
  0x73   :  { %1257 = vmatprep.subr.bf16.mxu1 %v1467_v55  ;;  %s1499_s4 = scalar_lea.vmem %s1110_s16, 128  ;;  %p1504_p9 = scmp.lt.s32.totalorder %s1110_s16, %s1110_s16 }
  0x74   :  { %p1500_p8 = scmp.ne.s32.totalorder %s1110_s16, %s1499_s4  ;;  %p1505_p10 = scmp.lt.s32.totalorder %s1499_s4, %s1499_s4 }
  0x75   :  { %773 = vmatpush1.bf16.msra.mxu0 %v1410_v33 }
  0x76   :  { %774 = vmatprep.subr.bf16.mxu0 %v1418_v35  ;;  %1258 = vmatpush3.bf16.msra.mxu1 %v1468_v56  ;;  %p1506_p11 = por %p1505_p10, %p1504_p9 }
  0x77   :  { %1259 = vmatprep.subr.bf16.mxu1 %v1469_v57 }
  0x78   :  { %p1507_p12 = pnand %p1506_p11, %p1500_p8 }
  0x79   :  { %775 = vmatpush1.bf16.msra.mxu0 %v1416_v37 }
  0x7a   :  { %776 = vmatprep.subr.bf16.mxu0 %v1424_v38  ;;  %1260 = vmatpush3.bf16.msra.mxu1 %v1470_v58 }
  0x7b   :  { %1261 = vmatprep.subr.bf16.mxu1 %v1471_v59 }
  0x7d   :  { %777 = vmatpush1.bf16.msra.mxu0 %v1422_v39 }
  0x7e   :  { %778 = vmatprep.subr.bf16.mxu0 %v1430_v40  ;;  %1262 = vmatpush3.bf16.msra.mxu1 %v1472_v60  ;;  %v1241_v40 = vld [vmem:[%s1695_s6] ss:$0 sm:$0xff] }
  0x7f   :  { %1274 = vmatprep.subr.bf16.mxu1 %v1529_v61 }
  0x81   :  { %779 = vmatpush1.bf16.msra.mxu0 %v1428_v41 }
  0x82   :  { %780 = vmatprep.subr.bf16.mxu0 %v1436_v42 }
  0x85   :  { %781 = vmatpush1.bf16.msra.mxu0 %v1434_v43 }
  0x86   :  { %782 = vmatprep.subr.bf16.mxu0 %v1442_v44 }
  0x89   :  { %783 = vmatpush1.bf16.msra.mxu0 %v1440_v45 }
  0x8a   :  { %784 = vmatprep.subr.bf16.mxu0 %v1447_v46 }
  0x8d   :  { %785 = vmatpush1.bf16.msra.mxu0 %v1445_v47 }
  0x8e   :  { %786 = vmatprep.subr.bf16.mxu0 %v1453_v48 }
  0x91   :  { %787 = vmatpush1.bf16.msra.mxu0 %v1451_v49 }
  0x94   :  { %789 = vmatmul.mubr.bf16.vlgmr.msra.gmra.mrb[0].mxu0 %v1122_v50 }
 0x12c   :  { %v708_v62 = vpop.f32.mrb[0].mxu1 }
 0x12d   :  { %v710_v63 = vpop.f32.mrb[1].mxu1  ;;  %v709_v13 = vadd.f32 %v708_v62, %v149_v11 }
 0x12e   :  { %v712_v0 = vpop.f32.mrb[2].mxu1  ;;  %v711_v14 = vadd.f32 %v710_v63, %v153_v12 }
 0x12f   :  { %v713_v1 = vpop.f32.mrb[3].mxu1 }
 0x134   :  { %v831_v2 = vpop.f32.mrb[4].mxu1 }
 0x135   :  { %v833_v3 = vpop.f32.mrb[5].mxu1 }
 0x136   :  { %v835_v4 = vpop.f32.mrb[6].mxu1 }
 0x137   :  { %v836_v5 = vpop.f32.mrb[7].mxu1 }
 0x167   :  { %v790_v15 = vpop.f32.mrb[0].mxu0 }
 0x168   :  { %v1287_v16 = vadd.f32 %v790_v15, %v709_v13  ;;  %v792_v17 = vpop.f32.mrb[1].mxu0 }
 0x169   :  { %v1290_v18 = vadd.f32 %v792_v17, %v711_v14  ;;  %v794_v19 = vpop.f32.mrb[2].mxu0 }
 0x16a   :  { %v1288_v20 = vadd.f32 %v1287_v16, %v831_v2  ;;  %v795_v21 = vpop.f32.mrb[3].mxu0 }
 0x16b   :  { %v1291_v22 = vadd.f32 %v1290_v18, %v833_v3 }
 0x16c   :  { %v838_v23 = vmax.f32 %v1288_v20, 0.0 }
 0x16d   :  { %v839_v24 = vmax.f32 %v1291_v22, 0.0 }
 0x16e   :  { %v840_v27 = vpack.c.bf16 %v838_v23, %v838_v23 }
 0x16f   :  { %v841_v25 = vpack.c.bf16 %v839_v24, %v839_v24 }
 0x171   :  { %1009 = vmatprep.mubr.bf16.mxu1 %v841_v25 }
 0x172   :  { %1010 = vmatmul.mubr.bf16.vlgmr.msra.gmra.mrb[8].mxu1 %v840_v27 }
 0x173   :  { %1275 = vmatpush3.bf16.msra.mxu1 %v1473_v26  ;;  %1282 = vmatprep.mubr.msk.bf16.mxu1 %vm1530_vm1, %v1529_v61 }
 0x174   :  { %1276 = vmatprep.subr.bf16.mxu1 %v1529_v61 }
 0x177   :  { %1277 = vmatpush3.bf16.msra.mxu1 %v1474_v28 }
 0x178   :  { %1278 = vmatprep.subr.bf16.mxu1 %v1529_v61 }
 0x17b   :  { %1279 = vmatpush3.bf16.msra.mxu1 %v1475_v29 }
 0x17c   :  { %1280 = vmatprep.subr.bf16.mxu1 %v1529_v61 }
 0x17f   :  { %1281 = vmatpush3.bf16.msra.mxu1 %v1476_v30 }
 0x245   :  { %v1263_v31 = vpop.f32.mrb[8].mxu1 }
 0x246   :  { %v1264_v33 = vpop.f32.mrb[9].mxu1 }
 0x247   :  { %v1265_v34 = vadd.f32 %v1264_v33, %v1263_v31  ;;  %v1266_v35 = vpop.f32.mrb[10].mxu1 }
 0x248   :  { %v1267_v36 = vpop.f32.mrb[11].mxu1 }
 0x249   :  { %v1012_v37 = vadd.f32 %v1265_v34, %v1224_v32 }
 0x24b   :  { %v1017_v38 = vmax.f32 %v1012_v37, 0.0 }
 0x24d   :  { %v1018_v39 = vpack.c.bf16 %v1017_v38, %v1017_v38 }
 0x24f   :  { %1283 = vmatmul.mubr.msk.bf16.vlgmr.msra.gmra.mrb[12].mxu1 %vm1058_vm2, %v1018_v39 }
 0x322   :  { %v1096_v41 = vpop.f32.mrb[12].mxu1 }
 0x323   :  { %v1097_v42 = vadd.f32 %v1241_v40, %v1096_v41  ;;  %v1284_v43 = vpop.f32.mrb[13].mxu1 }
 0x324   :  { %v1099_v44 = vpop.f32.mrb[14].mxu1 }
 0x325   :  { %1102 = vst [vmem:[#allocation5] sm:$0xff] %v1097_v42  ;;  %v1285_v45 = vpop.f32.mrb[15].mxu1 }
 0x326   :  { %1510 = shalt.err (!%p1507_p12)
}
 0x327   :  { %s1511_s6 = scalar_lea.hbm %s1696_s7, 128 }
 0x328   :  { %p1512_p13 = scmp.ne.s32.totalorder %s1696_s7, %s1511_s6  ;;  %p1515_p0 = scmp.lt.u32.totalorder %s1511_s6, %s1696_s7 }
 0x32a   :  { %p1517_p1 = pnand %p1515_p0, %p1512_p13 }
 0x32c   :  { %1520 = shalt.err (!%p1517_p1)
}
 0x32d   :  { %1112 = dma.vmem_to_hbm [thread:$0]  %s1110_s16, 128, %s1696_s7, [#allocation4]  }
 0x32e   :  { %1523 = dma.done.wait [#allocation4], 128  }
 0x32f   :  { %1524 = vsyncadd [#allocation4], 4294967168 }
 0x330   :  { %1116 = vsyncpa [#allocation3], 1 }
 0x331   :  { %1117 = vsyncpa [#allocation4], 1 }

</bundles_post_ra>
